<compile_context>
chip_gen: v6e
topology: v6e:2x2x1
jax: 0.10.0
libtpu: 0.0.40
codegen_flags: <defaults>
</compile_context>

<pallas_src>
import jax
import jax.numpy as jnp
from jax.experimental import pallas as pl
from jax.experimental.pallas import tpu as pltpu

_ENC_M_TILE = 256    # encoder row tile (multiple of 8); weight slab stays resident across m
_DEC_M_TILE = 512    # decoder row tile; divisible by _ENC_M_TILE so one M padding serves both
_F_TILE = 1024       # feature tile (multiple of 128); decoder k-axis and encoder out-axis


def _round_up(x, a):
    return (x + a - 1) // a * a


def _row_tiles(M):
    """(encoder mt, decoder mt, padded M).  enc_mt divides dec_mt divides M_pad."""
    m8 = _round_up(M, 8)
    if m8 >= _DEC_M_TILE:
        mt_dec = _DEC_M_TILE
        mt_enc = _ENC_M_TILE          # divides _DEC_M_TILE by construction
        m_pad = _round_up(M, mt_dec)
    else:
        mt_dec = mt_enc = m8
        m_pad = m8
    return mt_enc, mt_dec, m_pad


def _feat_tile(F):
    """(feature tile, padded F).  Prefer a divisor tile of round_up(F,128) (no extra
    padding); fall back to padding F up to a multiple of _F_TILE (few % waste)."""
    f128 = _round_up(F, 128)
    t = min(_F_TILE, f128)
    best = None
    while t >= 128:
        if f128 % t == 0:
            best = t
            break
        t -= 128
    if best is not None and best >= min(512, f128):
        return best, f128
    return _F_TILE, _round_up(f128, _F_TILE)


def _pair_ids(n):
    """Lower-triangle (target, source) enumeration, target-major: (0,0),(1,0),(1,1),..."""
    tgt, src = [], []
    for t in range(n):
        for s in range(t + 1):
            tgt.append(t)
            src.append(s)
    return jnp.asarray(tgt, jnp.int32), jnp.asarray(src, jnp.int32)


def _vmem_limit(block_bytes):
    # double-buffered blocks + margin; floor 32 MiB, cap 128 MiB
    return int(min(max(2 * block_bytes + (4 << 20), 32 << 20), 128 << 20))


# ---------------------------------------------------------------------------
# Kernels
# ---------------------------------------------------------------------------
def encoder_kernel(thr_ref, x_ref, w_ref, b_ref, y_ref):
    # thr_ref: (L,) f32 SMEM; x_ref: (1, mt, H) [compute dtype]; w_ref: (1, H, ft)
    # [compute dtype]; b_ref: (1, 1, ft) f32; y_ref: (1, mt, ft) [compute dtype].
    l = pl.program_id(0)
    pre = jnp.dot(x_ref[0], w_ref[0], preferred_element_type=jnp.float32) + b_ref[0]
    # JumpReLU (eval mode): x * (x > threshold)
    y_ref[0] = jnp.where(pre > thr_ref[l], pre, 0.0).astype(y_ref.dtype)


def decoder_kernel(tgt_ref, src_ref, feat_ref, w_ref, bsum_ref, out_ref):
    # Grid: (m, pair, k); pair/k are sequential ("arbitrary").
    # feat_ref: (1, mt, ft) [compute dtype], source layer src[p]
    # w_ref:    (1, ft, H)  [compute dtype], packed lower-triangle decoder weight p
    # bsum_ref: (1, 1, H)   f32 pre-summed bias for target tgt[p]
    # out_ref:  (1, mt, H)  f32, resident across the pair/k axes for a given (target, m)
    p = pl.program_id(1)
    k = pl.program_id(2)

    @pl.when((src_ref[p] == 0) & (k == 0))
    def _():  # first visit of this target's output block: init with the summed bias
        out_ref[0] = jnp.broadcast_to(bsum_ref[0], out_ref.shape[1:]).astype(out_ref.dtype)

    out_ref[0] += jnp.dot(feat_ref[0], w_ref[0], preferred_element_type=jnp.float32)


# ---------------------------------------------------------------------------
# Pallas wrappers
# ---------------------------------------------------------------------------
def clt_encode(x, w_enc_c, b_enc_r, thresholds, *, mt, ft):
    n, M_pad, H = x.shape
    F_pad = w_enc_c.shape[-1]
    xi = jnp.dtype(x.dtype).itemsize
    wi = jnp.dtype(w_enc_c.dtype).itemsize
    block_bytes = mt * H * xi + H * ft * wi + ft * 4 + mt * ft * xi
    grid_spec = pl.GridSpec(
        grid=(n, F_pad // ft, M_pad // mt),  # m innermost -> weight slab resident over m
        in_specs=[
            pl.BlockSpec(memory_space=pltpu.MemorySpace.SMEM),     # thresholds (n,)
            pl.BlockSpec((1, mt, H), lambda l, f, m: (l, m, 0)),   # x
            pl.BlockSpec((1, H, ft), lambda l, f, m: (l, 0, f)),   # W_enc^T (indep. of m)
            pl.BlockSpec((1, 1, ft), lambda l, f, m: (l, 0, f)),   # b_enc
        ],
        out_specs=pl.BlockSpec((1, mt, ft), lambda l, f, m: (l, m, f)),
    )
    return pl.pallas_call(
        encoder_kernel,
        out_shape=jax.ShapeDtypeStruct((n, M_pad, F_pad), x.dtype),  # feats in compute dtype
        grid_spec=grid_spec,
        compiler_params=pltpu.CompilerParams(
            dimension_semantics=("parallel", "parallel", "parallel"),
            vmem_limit_bytes=_vmem_limit(block_bytes)),
    )(thresholds, x, w_enc_c, b_enc_r)


def clt_decode(feats, w_dec_c, b_sum, tgt_ids, src_ids, *, mt, ft):
    n, M_pad, F_pad = feats.shape
    P, _, H = w_dec_c.shape
    fi = jnp.dtype(feats.dtype).itemsize
    wi = jnp.dtype(w_dec_c.dtype).itemsize
    block_bytes = mt * ft * fi + ft * H * wi + H * 4 + mt * H * 4
    grid_spec = pltpu.PrefetchScalarGridSpec(
        num_scalar_prefetch=2,                 # tgt_ids, src_ids -> SMEM
        grid=(M_pad // mt, P, F_pad // ft),    # (m, pair, k); pair/k are reduction axes
        in_specs=[
            pl.BlockSpec((1, mt, ft), lambda m, p, k, tgt, src: (src[p], m, k)),  # feats
            pl.BlockSpec((1, ft, H), lambda m, p, k, tgt, src: (p, k, 0)),        # packed W_dec^T
            pl.BlockSpec((1, 1, H), lambda m, p, k, tgt, src: (tgt[p], 0, 0)),    # b_sum[target]
        ],
        out_specs=pl.BlockSpec((1, mt, H), lambda m, p, k, tgt, src: (tgt[p], m, 0)),
    )
    return pl.pallas_call(
        decoder_kernel,
        out_shape=jax.ShapeDtypeStruct((n, M_pad, H), jnp.float32),
        grid_spec=grid_spec,
        compiler_params=pltpu.CompilerParams(
            # pair/k MUST stay sequential ("arbitrary") for the bias-init scheme.
            dimension_semantics=("parallel", "arbitrary", "arbitrary"),
            vmem_limit_bytes=_vmem_limit(block_bytes)),
    )(tgt_ids, src_ids, feats, w_dec_c, b_sum)


# ---------------------------------------------------------------------------
# Parameter preparation (one-time, at "load" time) and forward pass
# ---------------------------------------------------------------------------
def prepare_clt_params(params, compute_dtype=jnp.bfloat16):
    """Hoists all per-forward weight work: cast to compute dtype, pad F to the tile,
    pre-sum decoder biases per target, build pair lookup tables."""
    w_enc_t, b_enc, w_dec_t, b_dec, thresholds = params
    L, H, F = w_enc_t.shape
    ft, F_pad = _feat_tile(F)
    pad = F_pad - F
    if pad:
        w_enc_t = jnp.pad(w_enc_t, ((0, 0), (0, 0), (0, pad)))
        b_enc = jnp.pad(b_enc, ((0, 0), (0, pad)))
        w_dec_t = jnp.pad(w_dec_t, ((0, 0), (0, pad), (0, 0)))
    tgt_ids, src_ids = _pair_ids(L)
    # Pre-summed decoder biases per target: b_sum[t] = sum_{s<=t} b_dec[t,s]  (exact linearity).
    b_sum = jnp.zeros((L, H), jnp.float32).at[tgt_ids].add(b_dec.astype(jnp.float32))[:, None, :]
    return dict(
        w_enc_c=w_enc_t.astype(compute_dtype),          # [L, H, F_pad]
        b_enc_r=b_enc[:, None, :].astype(jnp.float32),  # [L, 1, F_pad]
        w_dec_c=w_dec_t.astype(compute_dtype),          # [P, F_pad, H] (lower-triangle packed)
        b_sum=b_sum,                                    # [L, 1, H]
        thresholds=thresholds.astype(jnp.float32),      # [L]
        tgt_ids=tgt_ids, src_ids=src_ids,
        L=L, H=H, F=F, F_pad=F_pad, ft=ft,
        compute_dtype=compute_dtype,
    )


def clt_forward(residual_stream_activations, prep):
    """Pallas implementation of CrossLayerTranscoder.forward (eval mode, no adapters)."""
    L, H, F = prep["L"], prep["H"], prep["F"]
    cd = prep["compute_dtype"]
    n = min(len(residual_stream_activations), L)
    B, S, _ = residual_stream_activations[0].shape
    M = B * S
    mt_enc, mt_dec, M_pad = _row_tiles(M)

    # Stack + cast in one shot (no separate f32 stack round-trip in HBM).
    x = jnp.stack([r.reshape(M, H).astype(cd) for r in residual_stream_activations[:n]])
    if M_pad > M:
        x = jnp.pad(x, ((0, 0), (0, M_pad - M), (0, 0)))

    Pn = n * (n + 1) // 2  # target-major ordering => first Pn pairs have target < n
    if n == L:
        w_enc, b_enc_r, thr = prep["w_enc_c"], prep["b_enc_r"], prep["thresholds"]
        w_dec, b_sum = prep["w_dec_c"], prep["b_sum"]
        tgt_ids, src_ids = prep["tgt_ids"], prep["src_ids"]
    else:
        w_enc, b_enc_r, thr = prep["w_enc_c"][:n], prep["b_enc_r"][:n], prep["thresholds"][:n]
        w_dec, b_sum = prep["w_dec_c"][:Pn], prep["b_sum"][:n]
        tgt_ids, src_ids = prep["tgt_ids"][:Pn], prep["src_ids"][:Pn]

    feats = clt_encode(x, w_enc, b_enc_r, thr, mt=mt_enc, ft=prep["ft"])          # [n, M_pad, F_pad] cd
    recon = clt_decode(feats, w_dec, b_sum, tgt_ids, src_ids, mt=mt_dec, ft=prep["ft"])  # [n, M_pad, H] f32

    reconstructed = [recon[i, :M].reshape(B, S, H) for i in range(n)]
    feature_acts = [feats[i, :M, :F].reshape(B, S, F) for i in range(n)]
    return reconstructed, feature_acts


# ---------------------------------------------------------------------------
# Deterministic parameter init (mirrors nn.Linear shapes; no checkpoint load)
# ---------------------------------------------------------------------------
def init_params(key, L, H, F):
    k0, k1, k2, k3 = jax.random.split(key, 4)
    ke = 1.0 / jnp.sqrt(jnp.float32(H))
    w_enc = jax.random.uniform(k0, (L, F, H), jnp.float32, -ke, ke)       # PyTorch [out, in]
    b_enc = jax.random.uniform(k1, (L, F), jnp.float32, -ke, ke)
    P = L * (L + 1) // 2
    kd = 1.0 / jnp.sqrt(jnp.float32(F))
    w_dec = jax.random.uniform(k2, (P, H, F), jnp.float32, -kd, kd)       # packed lower triangle
    b_dec = jax.random.uniform(k3, (P, H), jnp.float32, -kd, kd)
    thresholds = jnp.full((L,), 0.01, dtype=jnp.float32)                  # JumpReLU thresholds
    # One-time transpose to [in, out] layout -> kernels never transpose weights in HBM.
    w_enc_t = jnp.transpose(w_enc, (0, 2, 1))                             # [L, H, F]
    w_dec_t = jnp.transpose(w_dec, (0, 2, 1))                             # [P, F, H]
    return w_enc_t, b_enc, w_dec_t, b_dec, thresholds


# ---------------------------------------------------------------------------
# Pure-JAX reference (semantics of the PyTorch forward, eval mode)
# ---------------------------------------------------------------------------
def clt_forward_ref(residual_list, params, compute_dtype=jnp.float32):
    w_enc_t, b_enc, w_dec_t, b_dec, thresholds = params
    L, H, F = w_enc_t.shape
    n = min(len(residual_list), L)
    feats = []
    for l in range(n):
        xl = residual_list[l].astype(compute_dtype)
        wl = w_enc_t[l].astype(compute_dtype)
        pre = jnp.dot(xl, wl, preferred_element_type=jnp.float32) + b_enc[l]
        act = jnp.where(pre > thresholds[l], pre, 0.0)
        feats.append(act.astype(compute_dtype))   # features stored in compute dtype

    def pidx(t, s):
        return t * (t + 1) // 2 + s

    recons = []
    for t in range(n):
        acc = jnp.zeros(residual_list[0].shape[:2] + (H,), jnp.float32)
        for s in range(t + 1):
            p = pidx(t, s)
            wp = w_dec_t[p].astype(compute_dtype)
            acc = acc + jnp.dot(feats[s], wp, preferred_element_type=jnp.float32) + b_dec[p]
        recons.append(acc)
    return recons, feats


if __name__ == "__main__":
    # Small config: hidden_size=32, num_layers=3, features_per_layer=64,
    # actual_hidden_size == hidden_size -> no input/output adapters.
    # TODO(synk): input/output adapters (use_input_adapter=True) are not implemented.
    L, H, F = 3, 32, 64
    B, S = 2, 8

    key = jax.random.PRNGKey(0)
    kp, kx = jax.random.split(key)
    params = init_params(kp, L, H, F)

    xkeys = jax.random.split(kx, L)
    residual_stream_activations = [
        jax.random.normal(xkeys[i], (B, S, H), jnp.float32) for i in range(L)
    ]

    # --- f32 path: tight semantic check --------------------------------------
    prep32 = prepare_clt_params(params, compute_dtype=jnp.float32)
    recon, feats = clt_forward(residual_stream_activations, prep32)
    recon = [jax.block_until_ready(r) for r in recon]
    feats = [jax.block_until_ready(f) for f in feats]
    recon_ref, feats_ref = clt_forward_ref(residual_stream_activations, params,
                                           compute_dtype=jnp.float32)
    for a, b in zip(feats, feats_ref):
        assert jnp.allclose(a, b, atol=1e-4, rtol=1e-4), "feature mismatch (f32)"
    for a, b in zip(recon, recon_ref):
        assert jnp.allclose(a, b, atol=1e-4, rtol=1e-4), "reconstruction mismatch (f32)"

    # --- bf16 MXU path (default fast path): check vs bf16-aware reference ----
    prep16 = prepare_clt_params(params, compute_dtype=jnp.bfloat16)
    recon16, feats16 = clt_forward(residual_stream_activations, prep16)
    recon16 = [jax.block_until_ready(r) for r in recon16]
    feats16 = [jax.block_until_ready(f) for f in feats16]
    recon16_ref, feats16_ref = clt_forward_ref(residual_stream_activations, params,
                                               compute_dtype=jnp.bfloat16)
    for a, b in zip(feats16, feats16_ref):
        assert jnp.allclose(a.astype(jnp.float32), b.astype(jnp.float32),
                            atol=1e-2, rtol=1e-2), "feature mismatch (bf16)"
    for a, b in zip(recon16, recon16_ref):
        assert jnp.allclose(a, b, atol=1e-2, rtol=1e-2), "reconstruction mismatch (bf16)"

    print("KERNEL_OK")
</pallas_src>

<mosaic_0001>
module attributes {stable_mosaic.version = 11 : i64} {
  func.func @encoder_kernel(%arg0: i32, %arg1: i32, %arg2: i32, %arg3: memref<3xf32, #tpu.memory_space<smem>>, %arg4: memref<1x16x32xf32, #tpu.memory_space<vmem>>, %arg5: memref<1x32x128xf32, #tpu.memory_space<vmem>>, %arg6: memref<1x1x128xf32, #tpu.memory_space<vmem>>, %arg7: memref<1x16x128xf32, #tpu.memory_space<vmem>>) attributes {dimension_semantics = [#tpu.dimension_semantics<parallel>, #tpu.dimension_semantics<parallel>, #tpu.dimension_semantics<parallel>], iteration_bounds = array<i64: 3, 1, 1>, scalar_prefetch = 0 : i64, scratch_operands = 0 : i64, tpu.core_type = #tpu.core_type<tc>, window_params = [{transform_indices = @transform_0, window_bounds = array<i64: 3>}, {transform_indices = @transform_1, window_bounds = array<i64: 1, 16, 32>}, {transform_indices = @transform_2, window_bounds = array<i64: 1, 32, 128>}, {transform_indices = @transform_3, window_bounds = array<i64: 1, 1, 128>}, {transform_indices = @transform_4, window_bounds = array<i64: 1, 16, 128>}]} {
    %c0 = arith.constant 0 : index
    %c0_0 = arith.constant 0 : index
    %c0_1 = arith.constant 0 : index
    %0 = vector.load %arg4[%c0, %c0_0, %c0_1] : memref<1x16x32xf32, #tpu.memory_space<vmem>>, vector<1x16x32xf32>
    %1 = vector.shape_cast %0 : vector<1x16x32xf32> to vector<16x32xf32>
    %c0_2 = arith.constant 0 : index
    %c0_3 = arith.constant 0 : index
    %c0_4 = arith.constant 0 : index
    %2 = vector.load %arg5[%c0_2, %c0_3, %c0_4] : memref<1x32x128xf32, #tpu.memory_space<vmem>>, vector<1x32x128xf32>
    %3 = vector.shape_cast %2 : vector<1x32x128xf32> to vector<32x128xf32>
    %cst = arith.constant dense<0.000000e+00> : vector<16x128xf32>
    %4 = tpu.matmul %1, %3, %cst {dimension_numbers = #tpu.dot_dimension_numbers<[1], [0], [0], [1], [0, 0, 1, 1], [], []>} : vector<16x32xf32>, vector<32x128xf32>, vector<16x128xf32> -> vector<16x128xf32>
    %c0_5 = arith.constant 0 : index
    %c0_6 = arith.constant 0 : index
    %c0_7 = arith.constant 0 : index
    %5 = vector.load %arg6[%c0_5, %c0_6, %c0_7] : memref<1x1x128xf32, #tpu.memory_space<vmem>>, vector<1x1x128xf32>
    %6 = vector.shape_cast %5 : vector<1x1x128xf32> to vector<1x128xf32>
    %7 = vector.broadcast %6 : vector<1x128xf32> to vector<16x128xf32>
    %8 = arith.addf %4, %7 : vector<16x128xf32>
    %9 = arith.index_cast %arg0 : i32 to index
    %10 = memref.load %arg3[%9] : memref<3xf32, #tpu.memory_space<smem>>
    %11 = vector.broadcast %10 : f32 to vector<16x128xf32>
    %12 = arith.cmpf ogt, %8, %11 : vector<16x128xf32>
    %cst_8 = arith.constant 0.000000e+00 : f32
    %13 = vector.broadcast %cst_8 : f32 to vector<16x128xf32>
    %14 = arith.select %12, %8, %13 : vector<16x128xi1>, vector<16x128xf32>
    %c0_9 = arith.constant 0 : index
    %c0_10 = arith.constant 0 : index
    %c0_11 = arith.constant 0 : index
    %15 = vector.load %arg7[%c0_9, %c0_10, %c0_11] : memref<1x16x128xf32, #tpu.memory_space<vmem>>, vector<1x16x128xf32>
    %16 = vector.shape_cast %15 : vector<1x16x128xf32> to vector<16x128xf32>
    %17 = vector.shape_cast %14 : vector<16x128xf32> to vector<1x16x128xf32>
    tpu.vector_store %arg7[%c0_9, %c0_10, %c0_11], %17 {strides = array<i32>} : memref<1x16x128xf32, #tpu.memory_space<vmem>>, vector<1x16x128xf32>,
    return
  }
  func.func @transform_0(%arg0: i32, %arg1: i32, %arg2: i32) -> i32 {
    %c0_i32 = arith.constant 0 : i32
    %c0_i32_0 = arith.constant 0 : i32
    return %c0_i32 : i32
  }
  func.func @transform_1(%arg0: i32, %arg1: i32, %arg2: i32) -> (i32, i32, i32) {
    %c0_i32 = arith.constant 0 : i32
    %c0_i32_0 = arith.constant 0 : i32
    return %arg0, %arg2, %c0_i32 : i32, i32, i32
  }
  func.func @transform_2(%arg0: i32, %arg1: i32, %arg2: i32) -> (i32, i32, i32) {
    %c0_i32 = arith.constant 0 : i32
    %c0_i32_0 = arith.constant 0 : i32
    return %arg0, %c0_i32, %arg1 : i32, i32, i32
  }
  func.func @transform_3(%arg0: i32, %arg1: i32, %arg2: i32) -> (i32, i32, i32) {
    %c0_i32 = arith.constant 0 : i32
    %c0_i32_0 = arith.constant 0 : i32
    return %arg0, %c0_i32, %arg1 : i32, i32, i32
  }
  func.func @transform_4(%arg0: i32, %arg1: i32, %arg2: i32) -> (i32, i32, i32) {
    %c0_i32 = arith.constant 0 : i32
    return %arg0, %arg2, %arg1 : i32, i32, i32
  }
}

</mosaic_0001>

<bundles_post_ra>
// kernel: tpu_custom_call.1
= control target key start
LH: loop header
LB: loop body
LE: loop exit
PB: predicated region body
PF: predicated region fallthrough
CT: control target
= control target key end

     0   :  { %s1096_s0 = inlined_call_operand.hbm [shape: f32[3], index: 0, kind: input, shape index: {}]   ;;  %s1097_s1 = inlined_call_operand.hbm [shape: f32[3,16,32], index: 1, kind: input, shape index: {}]   ;;  %s1098_s2 = inlined_call_operand.hbm [shape: f32[3,32,128], index: 2, kind: input, shape index: {}]   ;;  %s1099_s3 = inlined_call_operand.vmem [shape: f32[3,1,128], index: 3, kind: input, shape index: {}]   ;;  %s1100_s4 = inlined_call_operand.hbm [shape: f32[3,16,128], index: 4, kind: output, shape index: {}]  }
   0x1   :  { %1104 = sst [smem:[#allocation17_spill]] %s1096_s0 }
   0x2   :  { %1105 = sst [smem:[#allocation18_spill]] %s1097_s1 }
   0x3   :  { %9 = vsyncpa [#allocation5], 0 }
   0x4   :  { %10 = vsyncpa [#allocation3], 0 }
   0x5   :  { %12 = vsyncpa [#allocation3 + $0x1], 0 }
   0x6   :  { %13 = vsyncpa [#allocation8], 0 }
   0x7   :  { %15 = vsyncpa [#allocation8 + $0x1], 0 }
   0x8   :  { %16 = vsyncpa [#allocation4], 0 }
   0x9   :  { %18 = vsyncpa [#allocation4 + $0x1], 0  ;;  %s901_s15 = smov 0   ;;  %s903_s16 = smov 0  }
   0xa   :  { %s905_s17 = smov 0   ;;  %s907_s18 = smov 0  }
   0xb   :  { %s909_s19 = smov 0   ;;  %s911_s20 = smov 0  }
   0xc LB: > { %1106 = sst [smem:[#allocation14_spill]] %s846_s15  ;;  %s585_s21 = sadd.s32 4294967295, %s866_s20   ;;  %s866_s20 = sphi %s911_s20, %s24_s20   ;;  %s862_s19 = sphi %s909_s19, %s1125_s19   ;;  %s858_s18 = sphi %s907_s18, %s1124_s18   ;;  %s854_s17 = sphi %s905_s17, %s1123_s17   ;;  %s850_s16 = sphi %s903_s16, %s1122_s16   ;;  %s846_s15 = sphi %s901_s15, %s1121_s15  }
   0xd   : > { %s586_s22 = sadd.s32 4294967294, %s866_s20   ;;  %s73_s23 = sadd.s32 1, %s854_s17 }
   0xe   : > { %p80_p0 = scmp.ne.s32.totalorder %s854_s17, %s850_s16  ;;  %p81_p1 = scmp.eq.s32.totalorder %s866_s20, 0 }
   0xf   : > { %p86_p2 = scmp.ne.s32.totalorder %s850_s16, %s846_s15  ;;  %p939_p3 = scmp.eq.s32.totalorder %s585_s21, 0 }
  0x10   : > { %p170_p4 = scmp.eq.s32.totalorder %s585_s21, 2  ;;  %p82_p5 = por %p81_p1, %p80_p0 }
  0x11   : > { %p176_p6 = scmp.eq.s32.totalorder %s586_s22, 2  ;;  %p945_p7 = por %p939_p3, %p86_p2 }
  0x12   : > { %p949_p8 = por %p170_p4, %p80_p0  ;;  %p587_p10 = scmp.ge.s32.totalorder %s866_s20, 1 }
  0x13   : > { %p953_p9 = por %p176_p6, %p86_p2  ;;  %p183_p11 = scmp.lt.s32.totalorder %s866_s20, 4 }
  0x14   : > { %p655_p13 = scmp.lt.s32.totalorder %s866_s20, 3  ;;  %s965_s29 = sand.u32 1, %s854_s17  }
  0x15   : > { %s1110_s27 = scalar_select %p953_p9, 1, 0 }
  0x16   : > { %p959_p12 = pnand %p587_p10, %p183_p11  ;;  %p969_p1 = pnand %p655_p13, %p82_p5 }
  0x17   : > { %1111 = sst [smem:[#allocation15_spill]] %s1110_s27  ;;  %s43_s5 = sadd.s32 1, %s862_s19 }
  0x18   : > { %p639_p0 = pneg %p959_p12  ;;  %s590_s6 = sshll.u32 %s965_s29, 4 }
  0x19   : > { %p45_p4 = scmp.ge.s32.totalorder %s43_s5, 3  ;;  %s868_s7 = smov [#allocation2]  }
  0x1a   : > { %p640_p2 = pnand %p639_p0, %p939_p3  ;;  %s1114_s0 = sld [smem:[#allocation17_spill]] }
  0x1b   : > { %s1127_s5 = smov (%p45_p4, %s43_s5), 0  ;;  %s609_s10 = sshll.u32 %s862_s19, 8 }
  0x1c   : > { %1115 = sst [smem:[#allocation16_spill]] %s1127_s5  ;;  %s68_s11 = ssub.s32 %s862_s19, %s1127_s5 }
  0x1d   : > { %s1116_s1 = sld [smem:[#allocation18_spill]]  ;;  %p71_p5 = scmp.eq.s32.totalorder %s68_s11, 0 }
  0x1e   : > { %s209_s21 = scalar_lea.vmem [#allocation6], %s590_s6  ;;  %s206_s15 = scalar_lea.sflag [#allocation3], %s965_s29 }
  0x1f   : > { %s218_s22 = sshll.u32 %s209_s21, 4  ;;  %p724_p6 = pneg %p969_p1  ;;  %s219_s22 = int_to_ptr.vmem [resolvable:$true] %s218_s22 }
  0x20   : > { %642 = dma.hbm_to_smem (!%p640_p2), %s1114_s0, 16, %s868_s7, [#allocation5]  }
  0x21   : > { %s991_s27 = scalar_select %p71_p5, %s854_s17, %s73_s23  }
  0x22   : > { %s735_s7 = scalar_lea.vmem %s219_s22, 256  ;;  %s869_s8 = smov [#allocation6]  }
  0x23   : > { %s217_s14 = scalar_lea.hbm %s1116_s1, %s609_s10  ;;  %p736_p10 = scmp.ne.s32.totalorder %s219_s22, %s735_s7 }
  0x24   : > { %s740_s9 = sshll.u32 %s869_s8, 4  ;;  %s741_s9 = int_to_ptr.vmem [resolvable:$false] %s740_s9 }
  0x25   : > { %p738_p11 = pnand %p736_p10, %p724_p6  ;;  %s742_s10 = scalar_lea.vmem %s741_s9, 512 }
  0x26   : > { %p743_p0 = scmp.lt.s32.totalorder %s219_s22, %s741_s9  ;;  %p744_p2 = scmp.lt.s32.totalorder %s742_s10, %s735_s7 }
  0x27   : > { %p739_p13 = pneg %p738_p11 }
  0x28   : > { %p745_p4 = por %p744_p2, %p743_p0 }
  0x2a   : > { %p746_p9 = pnand %p745_p4, %p739_p13 }
  0x2c   : > { %749 = shalt.err (!%p746_p9)
}
  0x2d   : > { %s870_s23 = smov 128   ;;  %s871_s6 = smov 8  }
  0x2e   : > { %646 = dma.hbm_to_vmem [thread:$0]  (!%p969_p1), %s217_s14, 256, %s219_s22, %s206_s15, %s870_s23, %s870_s23, %s871_s6  }
  0x2f   : > { %s593_s11 = sshll.u32 %s965_s29, 5  ;;  %s610_s12 = sshll.u32 %s862_s19, 9 }
  0x30   : > { %s239_s8 = scalar_lea.hbm %s1098_s2, %s610_s12  ;;  %s232_s9 = scalar_lea.vmem [#allocation7], %s593_s11 }
  0x31   : > { %s240_s7 = sshll.u32 %s232_s9, 4  ;;  %s229_s10 = scalar_lea.sflag [#allocation8], %s965_s29  ;;  %s241_s7 = int_to_ptr.vmem [resolvable:$true] %s240_s7 }
  0x32   : > { %s763_s0 = scalar_lea.vmem %s241_s7, 512  ;;  %s872_s1 = smov [#allocation7]  }
  0x33   : > { %p764_p9 = scmp.ne.s32.totalorder %s241_s7, %s763_s0  ;;  %s768_s5 = sshll.u32 %s872_s1, 4  ;;  %s769_s5 = int_to_ptr.vmem [resolvable:$false] %s768_s5 }
  0x34   : > { %s770_s15 = scalar_lea.vmem %s769_s5, 1024  ;;  %p771_p11 = scmp.lt.s32.totalorder %s241_s7, %s769_s5 }
  0x35   : > { %p766_p5 = pnand %p764_p9, %p724_p6  ;;  %p772_p13 = scmp.lt.s32.totalorder %s770_s15, %s763_s0 }
  0x37   : > { %p767_p10 = pneg %p766_p5  ;;  %p773_p0 = por %p772_p13, %p771_p11 }
  0x39   : > { %p774_p2 = pnand %p773_p0, %p767_p10 }
  0x3b   : > { %777 = shalt.err (!%p774_p2)
}
  0x3c   : > { %649 = dma.hbm_to_vmem [thread:$0]  (!%p969_p1), %s239_s8, 512, %s241_s7, %s229_s10, %s870_s23, %s870_s23, %s871_s6  }
  0x3d   : > { %261 = sbr.rel (%p959_p12) target bundleno = 298 (0x12a), region = 36 }
  0x42   : > { %829 = dma.done.wait (%p939_p3), [#allocation5], 16  }
  0x43   : > { %831 = vsyncadd (%p939_p3), [#allocation5], 4294967280  ;;  %s1019_s1 = sand.u32 1, %s850_s16  }
  0x44   : > { %s598_s0 = sshll.u32 %s1019_s1, 4  ;;  %s268_s29 = scalar_lea.sflag [#allocation3], %s1019_s1 }
  0x45   : > { %s271_s30 = scalar_lea.vmem [#allocation6], %s598_s0 }
  0x46   : > { %833 = dma.done.wait (%p945_p7), %s268_s29, 256  }
  0x47   : > { %835 = vsyncadd (%p945_p7), %s268_s29, 4294967040  ;;  %s599_s24 = sshll.u32 %s1019_s1, 5  ;;  %s277_s28 = scalar_lea.sflag [#allocation8], %s1019_s1 }
  0x48   : > { %s280_s5 = scalar_lea.vmem [#allocation7], %s599_s24 }
  0x49   : > { %837 = dma.done.wait (%p945_p7), %s277_s28, 512  }
  0x4a   : > { %839 = vsyncadd (%p945_p7), %s277_s28, 4294966784 }
  0x4b   : > { %285 = sfence }
  0x4c   : > { %v330_v0 = vld [vmem:[%s280_s5 + $0x18] sm:$0xff]  ;;  %v329_v1 = vld [vmem:[%s280_s5 + $0x10] sm:$0xff]  ;;  %vm338_vm0 = vcmask 261120   ;;  %v328_v3 = vld [vmem:[%s280_s5 + $0x8] sm:$0xff]  ;;  %p318_p3 = scmp.lt.s32.totalorder %s858_s18, 2  ;;  %s420_s14 = sld [smem:[#allocation2 + %s858_s18]] }
  0x4d   : > { %618 = vmatprep.subr.mxu0 %v330_v0  ;;  %v325_v2 = vld [vmem:[%s271_s30] sm:$0xff]  ;;  %v326_v5 = vld [vmem:[%s271_s30 + $0x8] sm:$0xff]  ;;  %s316_s11 = scalar_lea.vmem [#allocation9], %s598_s0  ;;  %s611_s13 = sshll.u32 %s858_s18, 8 }
  0x4e   : > { %619 = vmatpush3.msra.mxu0 %v330_v0  ;;  %626 = vmatprep.mubr.msk.f32.mxu0 %vm338_vm0, %v325_v2  ;;  %v327_v4 = vld [vmem:[%s280_s5] sm:$0xff]  ;;  %s319_s25 = scalar_select %p318_p3, %s858_s18, 2 }
  0x4f   : > { %620 = vmatprep.subr.mxu0 %v329_v1  ;;  %s445_s12 = sshll.u32 %s316_s11, 4  ;;  %s1049_s9 = scalar_lea.hbm %s1100_s4, %s611_s13  ;;  %s1044_s12 = int_to_ptr.vmem [resolvable:$true] %s445_s12 }
  0x50   : > { %621 = vmatpush3.msra.mxu0 %v329_v1  ;;  %s323_s6 = scalar_lea.vmem %s1099_s3, %s319_s25  ;;  %s429_s7 = scalar_lea.sflag [#allocation4], %s1019_s1 }
  0x51   : > { %622 = vmatprep.subr.mxu0 %v328_v3  ;;  %v601_v6 = vld [vmem:[%s323_s6] ss:$0 sm:$0xff]  ;;  %s778_s18 = scalar_lea.vmem %s1044_s12, 256  ;;  %s873_s10 = smov [#allocation9]  }
  0x52   : > { %623 = vmatpush3.msra.mxu0 %v328_v3  ;;  %v421_v8 = vstv %s420_s14  ;;  %p779_p7 = scmp.ne.s32.totalorder %s1044_s12, %s778_s18  ;;  %s782_s15 = sshll.u32 %s873_s10, 4  ;;  %s783_s15 = int_to_ptr.vmem [resolvable:$false] %s782_s15 }
  0x53   : > { %624 = vmatprep.subr.mxu0 %v327_v4  ;;  %s784_s0 = scalar_lea.vmem %s783_s15, 512  ;;  %p785_p6 = scmp.lt.s32.totalorder %s1044_s12, %s783_s15 }
  0x54   : > { %625 = vmatpush3.msra.mxu0 %v327_v4  ;;  %p780_p12 = pnand %p779_p7, %p949_p8  ;;  %p786_p4 = scmp.lt.s32.totalorder %s784_s0, %s778_s18 }
  0x55   : > { %627 = vmatmul.mubr.msk.f32.vlgmr.msra.gmra.mxu0 %vm338_vm0, %v326_v5 }
  0x56   : > { %p781_p1 = pneg %p780_p12  ;;  %p787_p9 = por %p786_p4, %p785_p6 }
  0x58   : > { %p788_p5 = pnand %p787_p9, %p781_p1 }
 0x115   : > { %v628_v7 = vpop.f32.mrf.mxu0 }
 0x116   : > { %v417_v9 = vadd.f32 %v628_v7, %v601_v6 }
 0x117   : > { %v411_v10 = vpop.f32.mrf.mxu0 }
 0x118   : > { %vm423_vm1 = vcmp.gt.f32.partialorder %v417_v9, %v421_v8  ;;  %v412_v11 = vadd.f32 %v601_v6, %v411_v10 }
 0x119   : > { %v425_v12 = vsel %vm423_vm1, %v417_v9, 0.0 }
 0x11a   : > { %427 = vst [vmem:[%s316_s11 + $0x8] sm:$0xff] %v425_v12  ;;  %vm422_vm2 = vcmp.gt.f32.partialorder %v412_v11, %v421_v8 }
 0x11b   : > { %v424_v13 = vsel %vm422_vm2, %v412_v11, 0.0 }
 0x11c   : > { %426 = vst [vmem:[%s316_s11] sm:$0xff] %v424_v13 }
 0x11d   : > { %791 = shalt.err (!%p788_p5)
}
 0x11e   : > { %s792_s29 = scalar_lea.hbm %s1049_s9, 256  ;;  %s796_s28 = scalar_lea.hbm %s1100_s4, 768 }
 0x11f   : > { %p793_p10 = scmp.ne.s32.totalorder %s1049_s9, %s792_s29  ;;  %p797_p0 = scmp.lt.s32.totalorder %s1049_s9, %s1100_s4 }
 0x120   : > { %p798_p2 = scmp.lt.s32.totalorder %s796_s28, %s792_s29 }
 0x121   : > { %p794_p11 = pnand %p793_p10, %p949_p8 }
 0x122   : > { %p799_p3 = por %p798_p2, %p797_p0 }
 0x123   : > { %p795_p13 = pneg %p794_p11 }
 0x125   : > { %p800_p7 = pnand %p799_p3, %p795_p13 }
 0x127   : > { %803 = shalt.err (!%p800_p7)
}
 0x128   : > { %s874_s14 = smov 128   ;;  %s875_s22 = smov 8  }
 0x129   : > { %637 = dma.vmem_to_hbm [thread:$0]  (%p949_p8), %s1044_s12, 256, %s1049_s9, %s429_s7, %s874_s14, %s874_s14, %s875_s22  }
 0x12a PF: > { %s1117_s23 = sld [smem:[#allocation14_spill]]  ;;  %p657_p12 = scmp.ge.s32.totalorder %s866_s20, 2 }
 0x12b   : > { %s1118_s6 = sld [smem:[#allocation15_spill]] }
 0x130   : > { %s460_s11 = sand.u32 1, %s1117_s23  }
 0x131   : > { %p1119_p1 = scmp.ne.s32.totalorder %s1118_s6, 0  ;;  %s461_s13 = scalar_lea.sflag [#allocation4], %s460_s11 }
 0x133   : > { %p651_p6 = pnand %p657_p12, %p1119_p1 }
 0x135   : > { %p652_p4 = pneg %p651_p6 }
 0x137   : > { %841 = dma.done.wait (%p652_p4), %s461_s13, 256  }
 0x138   : > { %843 = vsyncadd (%p652_p4), %s461_s13, 4294967040  ;;  %s24_s20 = sadd.s32 1, %s866_s20   ;;  %s1120_s26 = sld [smem:[#allocation16_spill]] }
 0x139   : > { %p21_p9 = scmp.ge.s32.totalorder %s24_s20, 5   ;;  %s1121_s15 = smov %s850_s16 }
 0x13a   : > { %s1122_s16 = smov %s854_s17  ;;  %s1123_s17 = smov %s991_s27 }
 0x13b   : > { %s1124_s18 = smov %s862_s19  ;;  %23 = sbr.rel (!%p21_p9) target bundleno = 12 (0xc), region = 102 }
 0x13e   : > { %s1125_s19 = smov %s1120_s26 }
 0x140   :  { %466 = vsyncpa [#allocation3], 1 }
 0x141   :  { %468 = vsyncpa [#allocation3 + $0x1], 1 }
 0x142   :  { %469 = vsyncpa [#allocation8], 1 }
 0x143   :  { %471 = vsyncpa [#allocation8 + $0x1], 1 }
 0x144   :  { %472 = vsyncpa [#allocation4], 1 }
 0x145   :  { %474 = vsyncpa [#allocation4 + $0x1], 1 }
 0x146   :  { %475 = vsyncpa [#allocation5], 1 }
 0x147   :  { %477 = vsyncpa [#allocation5 + $0x1], 1 }

</bundles_post_ra>
